<compile_context>
chip_gen: v7x
topology: tpu7x:2x2x1
jax: 0.10.0
libtpu: 0.0.40
codegen_flags: <defaults>
</compile_context>

<pallas_src>
import functools

import jax
import jax.numpy as jnp
from jax.experimental import pallas as pl
from jax.experimental.pallas import tpu as pltpu

LEAKY_SLOPE = 0.2            # nn.LeakyReLU(0.2)
BN_EPS = 1e-5                # nn.BatchNorm2d default eps
K = 3                        # kernel_size=3 -> padding (1, 1), "same" output
MXU_DTYPE = jnp.bfloat16     # MXU operand dtype; accumulation / BN math stay f32


def _round_up(x, m):
    return (x + m - 1) // m * m


def _band_weights(w, width):
    """(3, 3, Ci, Co) HWIO -> (3, W*Ci, W*Co) block-banded weights.

    Folds the dx taps into a banded matrix acting on the lane-packed (W*C) axis:
    block (wi, wo) = w[dy, wi - wo + 1] when that dx is in range, else 0.  The W-direction
    zero-padding of the conv is implied by the missing (zero) blocks.
    """
    kh, kw, ci, co = w.shape
    wi = jnp.arange(width)[:, None]
    wo = jnp.arange(width)[None, :]
    dx = wi - wo + (kw // 2)
    ok = ((dx >= 0) & (dx < kw)).astype(w.dtype)
    blocks = w[:, jnp.clip(dx, 0, kw - 1)] * ok[None, :, :, None, None]  # (kh, W, W, Ci, Co)
    return blocks.transpose(0, 1, 3, 2, 4).reshape(kh, width * ci, width * co)


def _channel_sum_lanes(v, cout):
    """v: (1, W*cout) f32.  Per-channel sums over the W lane blocks, replicated back into
    the packed lane layout, via a log2(W) lane-roll (XLU) butterfly.  Needs W power of 2."""
    lanes = v.shape[-1]
    step = cout
    while step < lanes:
        v = v + pltpu.roll(v, step, axis=1)
        step *= 2
    return v


def _double_conv_kernel(x_ref, wb1_ref, g1_ref, be1_ref, wb2_ref, g2_ref, be2_ref,
                        o_ref, *, hp, width, cout):
    """Fused (3x3 conv -> BatchNorm(batch stats) -> LeakyReLU(0.2)) * 2 in packed layout.

    x_ref:   (N, H, W*Cin)        f32   lane-packed input (NHWC with W,C merged into lanes)
    wb1_ref: (3, W*Cin,  W*Cout)  bf16  stage-1 block-banded weights (one slab per dy)
    wb2_ref: (3, W*Cout, W*Cout)  bf16  stage-2 block-banded weights
    g*_ref / be*_ref: (1, W*Cout) f32   BN gamma / beta tiled into the packed lane layout
    o_ref:   (N, H, W*Cout)       f32   lane-dense output (last dim 128 here -> unmasked vst)
    """
    N, H, L1 = x_ref.shape
    L2 = o_ref.shape[-1]
    R = N * hp                                   # packed rows incl. (hp - H) halo rows/image
    inv_m = 1.0 / (N * H * width)                # BN count per channel

    # Rows holding real pixels; halo rows are masked out of the BN statistics and re-zeroed
    # before feeding the next conv.
    row = jax.lax.broadcasted_iota(jnp.int32, (R, 1), 0)
    valid = (row % hp) < H                       # (R, 1) bool

    def conv3x3(p, wb_ref):
        # 3 banded matmuls (one per dy).  dy shift = XLU sublane roll: the wrap lands on the
        # zero halo rows of the adjacent image slab, so image boundaries stay correct.
        # dx is entirely inside the banded weights -> no window slices / copies.
        acc = None
        for dy in range(K):
            s = (1 - dy) % R                     # +1, 0, -1 row shift
            shifted = p if s == 0 else pltpu.roll(p, s, axis=0)
            t = jnp.dot(shifted.astype(MXU_DTYPE), wb_ref[dy],
                        preferred_element_type=jnp.float32)
            acc = t if acc is None else acc + t
        return acc                               # (R, L_out) f32

    def bn_act(y, g_ref, be_ref):
        # Training-mode BatchNorm with two-pass (numerically stable) batch statistics,
        # computed entirely in the packed lane layout (no cross-lane reshapes).
        ym = jnp.where(valid, y, 0.0)
        mean = _channel_sum_lanes(jnp.sum(ym, axis=0, keepdims=True), cout) * inv_m
        d = jnp.where(valid, y - mean, 0.0)
        var = _channel_sum_lanes(jnp.sum(d * d, axis=0, keepdims=True), cout) * inv_m
        scale = g_ref[...] * jax.lax.rsqrt(var + BN_EPS)
        z = (y - mean) * scale + be_ref[...]
        return jnp.where(z > 0, z, LEAKY_SLOPE * z)          # LeakyReLU(0.2)

    # ---- stage 1: pack into (N*Hp, W*Cin); only the (Hp - H) halo rows are zero-filled ----
    p1 = jnp.concatenate(
        [x_ref[...], jnp.zeros((N, hp - H, L1), x_ref.dtype)], axis=1).reshape(R, L1)
    a1 = bn_act(conv3x3(p1, wb1_ref), g1_ref, be1_ref)

    # ---- stage 2: activation never leaves VMEM/vregs; re-zero halo rows for the conv ------
    p2 = jnp.where(valid, a1, 0.0)
    a2 = bn_act(conv3x3(p2, wb2_ref), g2_ref, be2_ref)

    # Lane-dense store: drop halo rows (aligned slice: H and Hp are sublane multiples) and
    # write the full-width (W*Cout = 128) rows with unmasked stores.
    o_ref[...] = a2.reshape(N, hp, L2)[:, :H, :].astype(o_ref.dtype)


def double_conv_forward(x_nchw, params):
    """Forward of double_conv: (conv3x3 => BatchNorm2d(train stats) => LeakyReLU(0.2)) * 2."""
    x = jnp.transpose(x_nchw, (0, 2, 3, 1))                  # NCHW -> NHWC (layout plumbing)
    N, H, W, Cin = x.shape
    Cout = params["w1"].shape[-1]
    assert W > 0 and (W & (W - 1)) == 0, "packed small-C path assumes W is a power of two"
    L1, L2 = W * Cin, W * Cout
    Hp = _round_up(H + 1, 8)                                 # halo rows, sublane aligned

    # TODO(synk): keep the surrounding model NHWC end-to-end to drop these two transposes
    # (full-tensor HBM round trips) for mem-bound production shapes.
    kern = functools.partial(_double_conv_kernel, hp=Hp, width=W, cout=Cout)
    vmem = pl.BlockSpec(memory_space=pltpu.MemorySpace.VMEM)

    out = pl.pallas_call(
        kern,
        out_shape=jax.ShapeDtypeStruct((N, H, L2), jnp.float32),
        in_specs=[vmem] * 7,
        out_specs=vmem,
    )(
        x.reshape(N, H, L1),                                             # (N, H, W*Cin)
        _band_weights(params["w1"], W).astype(MXU_DTYPE),                # (3, W*Cin,  W*Cout)
        jnp.tile(params["g1"].reshape(1, Cout), (1, W)),                 # (1, W*Cout)
        jnp.tile(params["beta1"].reshape(1, Cout), (1, W)),
        _band_weights(params["w2"], W).astype(MXU_DTYPE),                # (3, W*Cout, W*Cout)
        jnp.tile(params["g2"].reshape(1, Cout), (1, W)),
        jnp.tile(params["beta2"].reshape(1, Cout), (1, W)),
    )
    # Conv biases b1/b2 are mathematically irrelevant: training-mode BatchNorm subtracts the
    # batch mean, so (y + b) - mean(y + b) == y - mean(y) exactly.
    out = out.reshape(N, H, W, Cout)
    return jnp.transpose(out, (0, 3, 1, 2))                  # NHWC -> NCHW


def init_params(key, in_ch, out_ch):
    """Deterministic init mirroring PyTorch defaults (kaiming-uniform conv, gamma=1, beta=0)."""
    k1, k2, k3, k4 = jax.random.split(key, 4)
    bound1 = 1.0 / jnp.sqrt(in_ch * K * K)
    bound2 = 1.0 / jnp.sqrt(out_ch * K * K)
    return {
        "w1": jax.random.uniform(k1, (K, K, in_ch, out_ch), jnp.float32, -bound1, bound1),
        "b1": jax.random.uniform(k2, (out_ch,), jnp.float32, -bound1, bound1),
        "g1": jnp.ones((out_ch,), jnp.float32),
        "beta1": jnp.zeros((out_ch,), jnp.float32),
        "w2": jax.random.uniform(k3, (K, K, out_ch, out_ch), jnp.float32, -bound2, bound2),
        "b2": jax.random.uniform(k4, (out_ch,), jnp.float32, -bound2, bound2),
        "g2": jnp.ones((out_ch,), jnp.float32),
        "beta2": jnp.zeros((out_ch,), jnp.float32),
    }


def _ref_stage(x, w, b, g, be, mxu_dtype):
    """Pure-JAX reference for one conv+BN+LeakyReLU stage (NHWC)."""
    prec = (jax.lax.Precision.HIGHEST if mxu_dtype == jnp.float32
            else jax.lax.Precision.DEFAULT)
    y = jax.lax.conv_general_dilated(
        x.astype(mxu_dtype), w.astype(mxu_dtype),
        window_strides=(1, 1), padding=((1, 1), (1, 1)),
        dimension_numbers=("NHWC", "HWIO", "NHWC"),
        preferred_element_type=jnp.float32,
        precision=prec) + b.reshape(1, 1, 1, -1)
    m = jnp.mean(y, axis=(0, 1, 2), keepdims=True)
    v = jnp.mean(jnp.square(y - m), axis=(0, 1, 2), keepdims=True)   # biased variance
    yh = (y - m) / jnp.sqrt(v + BN_EPS) * g.reshape(1, 1, 1, -1) + be.reshape(1, 1, 1, -1)
    return jnp.where(yh > 0, yh, LEAKY_SLOPE * yh)


def double_conv_reference(x_nchw, params, mxu_dtype=jnp.float32):
    x = jnp.transpose(x_nchw, (0, 2, 3, 1))
    x = _ref_stage(x, params["w1"], params["b1"], params["g1"], params["beta1"], mxu_dtype)
    x = _ref_stage(x, params["w2"], params["b2"], params["g2"], params["beta2"], mxu_dtype)
    return jnp.transpose(x, (0, 3, 1, 2))


if __name__ == "__main__":
    key = jax.random.PRNGKey(0)
    kx, kp = jax.random.split(key)

    N, in_ch, out_ch, S = 2, 4, 8, 16
    x = jax.random.normal(kx, (N, in_ch, S, S), dtype=jnp.float32)    # NCHW like PyTorch
    params = init_params(kp, in_ch, out_ch)

    out = jax.block_until_ready(double_conv_forward(x, params))
    assert out.shape == (N, out_ch, S, S), out.shape

    # Tight check vs. a matched-precision reference (bf16 MXU feeds, f32 accumulation).
    ref_mx = double_conv_reference(x, params, MXU_DTYPE)
    err_mx = float(jnp.max(jnp.abs(out - ref_mx)))
    assert jnp.allclose(out, ref_mx, rtol=5e-3, atol=5e-3), f"matched-precision err={err_mx}"

    # Loose check vs. the full-f32 (PyTorch-fidelity) reference; the gap is purely the
    # bf16 operand rounding of the MXU feeds.
    ref_f32 = double_conv_reference(x, params, jnp.float32)
    err_f32 = float(jnp.max(jnp.abs(out - ref_f32)))
    assert jnp.allclose(out, ref_f32, rtol=5e-2, atol=5e-2), f"f32-reference err={err_f32}"

    print("KERNEL_OK")
</pallas_src>

<mosaic_0001>
module attributes {stable_mosaic.version = 11 : i64} {
  func.func @_double_conv_kernel(%arg0: memref<2x16x64xf32, #tpu.memory_space<vmem>>, %arg1: memref<3x64x128xbf16, #tpu.memory_space<vmem>>, %arg2: memref<1x128xf32, #tpu.memory_space<vmem>>, %arg3: memref<1x128xf32, #tpu.memory_space<vmem>>, %arg4: memref<3x128x128xbf16, #tpu.memory_space<vmem>>, %arg5: memref<1x128xf32, #tpu.memory_space<vmem>>, %arg6: memref<1x128xf32, #tpu.memory_space<vmem>>, %arg7: memref<2x16x128xf32, #tpu.memory_space<vmem>>) attributes {dimension_semantics = [], scalar_prefetch = 0 : i64, scratch_operands = 0 : i64, tpu.core_type = #tpu.core_type<tc>} {
    %0 = tpu.iota {dimensions = array<i32: 0>} : vector<48x1xi32>
    %c24_i32 = arith.constant 24 : i32
    %c0_i32 = arith.constant 0 : i32
    %1 = arith.cmpi eq, %c24_i32, %c0_i32 : i32
    %c1_i32 = arith.constant 1 : i32
    %2 = arith.select %1, %c1_i32, %c24_i32 : i32
    %3 = vector.broadcast %2 : i32 to vector<48x1xi32>
    %4 = arith.remsi %0, %3 : vector<48x1xi32>
    %c0_i32_0 = arith.constant 0 : i32
    %5 = vector.broadcast %c0_i32_0 : i32 to vector<48x1xi32>
    %6 = arith.cmpi ne, %4, %5 : vector<48x1xi32>
    %c0_i32_1 = arith.constant 0 : i32
    %7 = vector.broadcast %c0_i32_1 : i32 to vector<48x1xi32>
    %8 = arith.cmpi slt, %4, %7 : vector<48x1xi32>
    %c0_i32_2 = arith.constant 0 : i32
    %9 = arith.cmpi slt, %2, %c0_i32_2 : i32
    %10 = vector.broadcast %9 : i1 to vector<48x1xi1>
    %11 = vector.broadcast %10 : vector<48x1xi1> to vector<48x1xi1>
    %12 = arith.xori %8, %11 : vector<48x1xi1>
    %13 = arith.andi %12, %6 : vector<48x1xi1>
    %14 = vector.broadcast %2 : i32 to vector<48x1xi32>
    %15 = arith.addi %4, %14 : vector<48x1xi32>
    %16 = arith.select %13, %15, %4 : vector<48x1xi1>, vector<48x1xi32>
    %c16_i32 = arith.constant 16 : i32
    %17 = vector.broadcast %c16_i32 : i32 to vector<48x1xi32>
    %18 = arith.cmpi slt, %16, %17 : vector<48x1xi32>
    %c0 = arith.constant 0 : index
    %c0_3 = arith.constant 0 : index
    %c0_4 = arith.constant 0 : index
    %19 = vector.load %arg0[%c0, %c0_3, %c0_4] : memref<2x16x64xf32, #tpu.memory_space<vmem>>, vector<2x16x64xf32>
    %cst = arith.constant 0.000000e+00 : f32
    %20 = vector.broadcast %cst : f32 to vector<2x8x64xf32>
    %21 = tpu.concatenate %19, %20 in 1 : vector<2x16x64xf32>, vector<2x8x64xf32> -> vector<2x24x64xf32>
    %22 = vector.shape_cast %21 : vector<2x24x64xf32> to vector<48x64xf32>
    %c1_i32_5 = arith.constant 1 : i32
    %23 = tpu.dynamic_rotate %22 by %c1_i32_5 dim 0 : vector<48x64xf32>, i32 -> vector<48x64xf32>
    %24 = arith.truncf %23 : vector<48x64xf32> to vector<48x64xbf16>
    %c0_6 = arith.constant 0 : index
    %c0_7 = arith.constant 0 : index
    %c0_8 = arith.constant 0 : index
    %25 = vector.load %arg1[%c0_6, %c0_7, %c0_8] : memref<3x64x128xbf16, #tpu.memory_space<vmem>>, vector<1x64x128xbf16>
    %26 = vector.shape_cast %25 : vector<1x64x128xbf16> to vector<64x128xbf16>
    %cst_9 = arith.constant dense<0.000000e+00> : vector<48x128xf32>
    %27 = tpu.matmul %24, %26, %cst_9 {dimension_numbers = #tpu.dot_dimension_numbers<[1], [0], [0], [1], [0, 0, 1, 1], [], []>} : vector<48x64xbf16>, vector<64x128xbf16>, vector<48x128xf32> -> vector<48x128xf32>
    %28 = arith.truncf %22 : vector<48x64xf32> to vector<48x64xbf16>
    %c1 = arith.constant 1 : index
    %c0_10 = arith.constant 0 : index
    %c0_11 = arith.constant 0 : index
    %29 = vector.load %arg1[%c1, %c0_10, %c0_11] : memref<3x64x128xbf16, #tpu.memory_space<vmem>>, vector<1x64x128xbf16>
    %30 = vector.shape_cast %29 : vector<1x64x128xbf16> to vector<64x128xbf16>
    %cst_12 = arith.constant dense<0.000000e+00> : vector<48x128xf32>
    %31 = tpu.matmul %28, %30, %cst_12 {dimension_numbers = #tpu.dot_dimension_numbers<[1], [0], [0], [1], [0, 0, 1, 1], [], []>} : vector<48x64xbf16>, vector<64x128xbf16>, vector<48x128xf32> -> vector<48x128xf32>
    %32 = arith.addf %27, %31 : vector<48x128xf32>
    %c47_i32 = arith.constant 47 : i32
    %33 = tpu.dynamic_rotate %22 by %c47_i32 dim 0 : vector<48x64xf32>, i32 -> vector<48x64xf32>
    %34 = arith.truncf %33 : vector<48x64xf32> to vector<48x64xbf16>
    %c2 = arith.constant 2 : index
    %c0_13 = arith.constant 0 : index
    %c0_14 = arith.constant 0 : index
    %35 = vector.load %arg1[%c2, %c0_13, %c0_14] : memref<3x64x128xbf16, #tpu.memory_space<vmem>>, vector<1x64x128xbf16>
    %36 = vector.shape_cast %35 : vector<1x64x128xbf16> to vector<64x128xbf16>
    %cst_15 = arith.constant dense<0.000000e+00> : vector<48x128xf32>
    %37 = tpu.matmul %34, %36, %cst_15 {dimension_numbers = #tpu.dot_dimension_numbers<[1], [0], [0], [1], [0, 0, 1, 1], [], []>} : vector<48x64xbf16>, vector<64x128xbf16>, vector<48x128xf32> -> vector<48x128xf32>
    %38 = arith.addf %32, %37 : vector<48x128xf32>
    %cst_16 = arith.constant 0.000000e+00 : f32
    %39 = vector.shape_cast %18 : vector<48x1xi1> to vector<48x1xi1>
    %40 = vector.broadcast %39 : vector<48x1xi1> to vector<48x128xi1>
    %41 = vector.broadcast %cst_16 : f32 to vector<48x128xf32>
    %42 = arith.select %40, %38, %41 : vector<48x128xi1>, vector<48x128xf32>
    %cst_17 = arith.constant dense<0.000000e+00> : vector<128xf32>
    %43 = vector.multi_reduction <add>, %42, %cst_17 [0] : vector<48x128xf32> to vector<128xf32>
    %44 = vector.shape_cast %43 : vector<128xf32> to vector<1x128xf32>
    %c8_i32 = arith.constant 8 : i32
    %45 = tpu.dynamic_rotate %44 by %c8_i32 dim 1 : vector<1x128xf32>, i32 -> vector<1x128xf32>
    %46 = arith.addf %44, %45 : vector<1x128xf32>
    %c16_i32_18 = arith.constant 16 : i32
    %47 = tpu.dynamic_rotate %46 by %c16_i32_18 dim 1 : vector<1x128xf32>, i32 -> vector<1x128xf32>
    %48 = arith.addf %46, %47 : vector<1x128xf32>
    %c32_i32 = arith.constant 32 : i32
    %49 = tpu.dynamic_rotate %48 by %c32_i32 dim 1 : vector<1x128xf32>, i32 -> vector<1x128xf32>
    %50 = arith.addf %48, %49 : vector<1x128xf32>
    %c64_i32 = arith.constant 64 : i32
    %51 = tpu.dynamic_rotate %50 by %c64_i32 dim 1 : vector<1x128xf32>, i32 -> vector<1x128xf32>
    %52 = arith.addf %50, %51 : vector<1x128xf32>
    %cst_19 = arith.constant 0.001953125 : f32
    %53 = vector.broadcast %cst_19 : f32 to vector<1x128xf32>
    %54 = arith.mulf %52, %53 : vector<1x128xf32>
    %55 = vector.broadcast %54 : vector<1x128xf32> to vector<48x128xf32>
    %56 = arith.subf %38, %55 : vector<48x128xf32>
    %cst_20 = arith.constant 0.000000e+00 : f32
    %57 = vector.shape_cast %18 : vector<48x1xi1> to vector<48x1xi1>
    %58 = vector.broadcast %57 : vector<48x1xi1> to vector<48x128xi1>
    %59 = vector.broadcast %cst_20 : f32 to vector<48x128xf32>
    %60 = arith.select %58, %56, %59 : vector<48x128xi1>, vector<48x128xf32>
    %61 = arith.mulf %60, %60 : vector<48x128xf32>
    %cst_21 = arith.constant dense<0.000000e+00> : vector<128xf32>
    %62 = vector.multi_reduction <add>, %61, %cst_21 [0] : vector<48x128xf32> to vector<128xf32>
    %63 = vector.shape_cast %62 : vector<128xf32> to vector<1x128xf32>
    %c8_i32_22 = arith.constant 8 : i32
    %64 = tpu.dynamic_rotate %63 by %c8_i32_22 dim 1 : vector<1x128xf32>, i32 -> vector<1x128xf32>
    %65 = arith.addf %63, %64 : vector<1x128xf32>
    %c16_i32_23 = arith.constant 16 : i32
    %66 = tpu.dynamic_rotate %65 by %c16_i32_23 dim 1 : vector<1x128xf32>, i32 -> vector<1x128xf32>
    %67 = arith.addf %65, %66 : vector<1x128xf32>
    %c32_i32_24 = arith.constant 32 : i32
    %68 = tpu.dynamic_rotate %67 by %c32_i32_24 dim 1 : vector<1x128xf32>, i32 -> vector<1x128xf32>
    %69 = arith.addf %67, %68 : vector<1x128xf32>
    %c64_i32_25 = arith.constant 64 : i32
    %70 = tpu.dynamic_rotate %69 by %c64_i32_25 dim 1 : vector<1x128xf32>, i32 -> vector<1x128xf32>
    %71 = arith.addf %69, %70 : vector<1x128xf32>
    %cst_26 = arith.constant 0.001953125 : f32
    %72 = vector.broadcast %cst_26 : f32 to vector<1x128xf32>
    %73 = arith.mulf %71, %72 : vector<1x128xf32>
    %c0_27 = arith.constant 0 : index
    %c0_28 = arith.constant 0 : index
    %74 = vector.load %arg2[%c0_27, %c0_28] : memref<1x128xf32, #tpu.memory_space<vmem>>, vector<1x128xf32>
    %cst_29 = arith.constant 9.99999974E-6 : f32
    %75 = vector.broadcast %cst_29 : f32 to vector<1x128xf32>
    %76 = arith.addf %73, %75 : vector<1x128xf32>
    %77 = math.rsqrt %76 : vector<1x128xf32>
    %78 = arith.mulf %74, %77 : vector<1x128xf32>
    %79 = vector.broadcast %54 : vector<1x128xf32> to vector<48x128xf32>
    %80 = arith.subf %38, %79 : vector<48x128xf32>
    %81 = vector.broadcast %78 : vector<1x128xf32> to vector<48x128xf32>
    %82 = arith.mulf %80, %81 : vector<48x128xf32>
    %c0_30 = arith.constant 0 : index
    %c0_31 = arith.constant 0 : index
    %83 = vector.load %arg3[%c0_30, %c0_31] : memref<1x128xf32, #tpu.memory_space<vmem>>, vector<1x128xf32>
    %84 = vector.broadcast %83 : vector<1x128xf32> to vector<48x128xf32>
    %85 = arith.addf %82, %84 : vector<48x128xf32>
    %cst_32 = arith.constant 0.000000e+00 : f32
    %86 = vector.broadcast %cst_32 : f32 to vector<48x128xf32>
    %87 = arith.cmpf ogt, %85, %86 : vector<48x128xf32>
    %cst_33 = arith.constant 2.000000e-01 : f32
    %88 = vector.broadcast %cst_33 : f32 to vector<48x128xf32>
    %89 = arith.mulf %88, %85 : vector<48x128xf32>
    %90 = arith.select %87, %85, %89 : vector<48x128xi1>, vector<48x128xf32>
    %cst_34 = arith.constant 0.000000e+00 : f32
    %91 = vector.shape_cast %18 : vector<48x1xi1> to vector<48x1xi1>
    %92 = vector.broadcast %91 : vector<48x1xi1> to vector<48x128xi1>
    %93 = vector.broadcast %cst_34 : f32 to vector<48x128xf32>
    %94 = arith.select %92, %90, %93 : vector<48x128xi1>, vector<48x128xf32>
    %c1_i32_35 = arith.constant 1 : i32
    %95 = tpu.dynamic_rotate %94 by %c1_i32_35 dim 0 : vector<48x128xf32>, i32 -> vector<48x128xf32>
    %96 = arith.truncf %95 : vector<48x128xf32> to vector<48x128xbf16>
    %c0_36 = arith.constant 0 : index
    %c0_37 = arith.constant 0 : index
    %c0_38 = arith.constant 0 : index
    %97 = vector.load %arg4[%c0_36, %c0_37, %c0_38] : memref<3x128x128xbf16, #tpu.memory_space<vmem>>, vector<1x128x128xbf16>
    %98 = vector.shape_cast %97 : vector<1x128x128xbf16> to vector<128x128xbf16>
    %cst_39 = arith.constant dense<0.000000e+00> : vector<48x128xf32>
    %99 = tpu.matmul %96, %98, %cst_39 {dimension_numbers = #tpu.dot_dimension_numbers<[1], [0], [0], [1], [0, 0, 1, 1], [], []>} : vector<48x128xbf16>, vector<128x128xbf16>, vector<48x128xf32> -> vector<48x128xf32>
    %100 = arith.truncf %94 : vector<48x128xf32> to vector<48x128xbf16>
    %c1_40 = arith.constant 1 : index
    %c0_41 = arith.constant 0 : index
    %c0_42 = arith.constant 0 : index
    %101 = vector.load %arg4[%c1_40, %c0_41, %c0_42] : memref<3x128x128xbf16, #tpu.memory_space<vmem>>, vector<1x128x128xbf16>
    %102 = vector.shape_cast %101 : vector<1x128x128xbf16> to vector<128x128xbf16>
    %cst_43 = arith.constant dense<0.000000e+00> : vector<48x128xf32>
    %103 = tpu.matmul %100, %102, %cst_43 {dimension_numbers = #tpu.dot_dimension_numbers<[1], [0], [0], [1], [0, 0, 1, 1], [], []>} : vector<48x128xbf16>, vector<128x128xbf16>, vector<48x128xf32> -> vector<48x128xf32>
    %104 = arith.addf %99, %103 : vector<48x128xf32>
    %c47_i32_44 = arith.constant 47 : i32
    %105 = tpu.dynamic_rotate %94 by %c47_i32_44 dim 0 : vector<48x128xf32>, i32 -> vector<48x128xf32>
    %106 = arith.truncf %105 : vector<48x128xf32> to vector<48x128xbf16>
    %c2_45 = arith.constant 2 : index
    %c0_46 = arith.constant 0 : index
    %c0_47 = arith.constant 0 : index
    %107 = vector.load %arg4[%c2_45, %c0_46, %c0_47] : memref<3x128x128xbf16, #tpu.memory_space<vmem>>, vector<1x128x128xbf16>
    %108 = vector.shape_cast %107 : vector<1x128x128xbf16> to vector<128x128xbf16>
    %cst_48 = arith.constant dense<0.000000e+00> : vector<48x128xf32>
    %109 = tpu.matmul %106, %108, %cst_48 {dimension_numbers = #tpu.dot_dimension_numbers<[1], [0], [0], [1], [0, 0, 1, 1], [], []>} : vector<48x128xbf16>, vector<128x128xbf16>, vector<48x128xf32> -> vector<48x128xf32>
    %110 = arith.addf %104, %109 : vector<48x128xf32>
    %cst_49 = arith.constant 0.000000e+00 : f32
    %111 = vector.shape_cast %18 : vector<48x1xi1> to vector<48x1xi1>
    %112 = vector.broadcast %111 : vector<48x1xi1> to vector<48x128xi1>
    %113 = vector.broadcast %cst_49 : f32 to vector<48x128xf32>
    %114 = arith.select %112, %110, %113 : vector<48x128xi1>, vector<48x128xf32>
    %cst_50 = arith.constant dense<0.000000e+00> : vector<128xf32>
    %115 = vector.multi_reduction <add>, %114, %cst_50 [0] : vector<48x128xf32> to vector<128xf32>
    %116 = vector.shape_cast %115 : vector<128xf32> to vector<1x128xf32>
    %c8_i32_51 = arith.constant 8 : i32
    %117 = tpu.dynamic_rotate %116 by %c8_i32_51 dim 1 : vector<1x128xf32>, i32 -> vector<1x128xf32>
    %118 = arith.addf %116, %117 : vector<1x128xf32>
    %c16_i32_52 = arith.constant 16 : i32
    %119 = tpu.dynamic_rotate %118 by %c16_i32_52 dim 1 : vector<1x128xf32>, i32 -> vector<1x128xf32>
    %120 = arith.addf %118, %119 : vector<1x128xf32>
    %c32_i32_53 = arith.constant 32 : i32
    %121 = tpu.dynamic_rotate %120 by %c32_i32_53 dim 1 : vector<1x128xf32>, i32 -> vector<1x128xf32>
    %122 = arith.addf %120, %121 : vector<1x128xf32>
    %c64_i32_54 = arith.constant 64 : i32
    %123 = tpu.dynamic_rotate %122 by %c64_i32_54 dim 1 : vector<1x128xf32>, i32 -> vector<1x128xf32>
    %124 = arith.addf %122, %123 : vector<1x128xf32>
    %cst_55 = arith.constant 0.001953125 : f32
    %125 = vector.broadcast %cst_55 : f32 to vector<1x128xf32>
    %126 = arith.mulf %124, %125 : vector<1x128xf32>
    %127 = vector.broadcast %126 : vector<1x128xf32> to vector<48x128xf32>
    %128 = arith.subf %110, %127 : vector<48x128xf32>
    %cst_56 = arith.constant 0.000000e+00 : f32
    %129 = vector.shape_cast %18 : vector<48x1xi1> to vector<48x1xi1>
    %130 = vector.broadcast %129 : vector<48x1xi1> to vector<48x128xi1>
    %131 = vector.broadcast %cst_56 : f32 to vector<48x128xf32>
    %132 = arith.select %130, %128, %131 : vector<48x128xi1>, vector<48x128xf32>
    %133 = arith.mulf %132, %132 : vector<48x128xf32>
    %cst_57 = arith.constant dense<0.000000e+00> : vector<128xf32>
    %134 = vector.multi_reduction <add>, %133, %cst_57 [0] : vector<48x128xf32> to vector<128xf32>
    %135 = vector.shape_cast %134 : vector<128xf32> to vector<1x128xf32>
    %c8_i32_58 = arith.constant 8 : i32
    %136 = tpu.dynamic_rotate %135 by %c8_i32_58 dim 1 : vector<1x128xf32>, i32 -> vector<1x128xf32>
    %137 = arith.addf %135, %136 : vector<1x128xf32>
    %c16_i32_59 = arith.constant 16 : i32
    %138 = tpu.dynamic_rotate %137 by %c16_i32_59 dim 1 : vector<1x128xf32>, i32 -> vector<1x128xf32>
    %139 = arith.addf %137, %138 : vector<1x128xf32>
    %c32_i32_60 = arith.constant 32 : i32
    %140 = tpu.dynamic_rotate %139 by %c32_i32_60 dim 1 : vector<1x128xf32>, i32 -> vector<1x128xf32>
    %141 = arith.addf %139, %140 : vector<1x128xf32>
    %c64_i32_61 = arith.constant 64 : i32
    %142 = tpu.dynamic_rotate %141 by %c64_i32_61 dim 1 : vector<1x128xf32>, i32 -> vector<1x128xf32>
    %143 = arith.addf %141, %142 : vector<1x128xf32>
    %cst_62 = arith.constant 0.001953125 : f32
    %144 = vector.broadcast %cst_62 : f32 to vector<1x128xf32>
    %145 = arith.mulf %143, %144 : vector<1x128xf32>
    %c0_63 = arith.constant 0 : index
    %c0_64 = arith.constant 0 : index
    %146 = vector.load %arg5[%c0_63, %c0_64] : memref<1x128xf32, #tpu.memory_space<vmem>>, vector<1x128xf32>
    %cst_65 = arith.constant 9.99999974E-6 : f32
    %147 = vector.broadcast %cst_65 : f32 to vector<1x128xf32>
    %148 = arith.addf %145, %147 : vector<1x128xf32>
    %149 = math.rsqrt %148 : vector<1x128xf32>
    %150 = arith.mulf %146, %149 : vector<1x128xf32>
    %151 = vector.broadcast %126 : vector<1x128xf32> to vector<48x128xf32>
    %152 = arith.subf %110, %151 : vector<48x128xf32>
    %153 = vector.broadcast %150 : vector<1x128xf32> to vector<48x128xf32>
    %154 = arith.mulf %152, %153 : vector<48x128xf32>
    %c0_66 = arith.constant 0 : index
    %c0_67 = arith.constant 0 : index
    %155 = vector.load %arg6[%c0_66, %c0_67] : memref<1x128xf32, #tpu.memory_space<vmem>>, vector<1x128xf32>
    %156 = vector.broadcast %155 : vector<1x128xf32> to vector<48x128xf32>
    %157 = arith.addf %154, %156 : vector<48x128xf32>
    %cst_68 = arith.constant 0.000000e+00 : f32
    %158 = vector.broadcast %cst_68 : f32 to vector<48x128xf32>
    %159 = arith.cmpf ogt, %157, %158 : vector<48x128xf32>
    %cst_69 = arith.constant 2.000000e-01 : f32
    %160 = vector.broadcast %cst_69 : f32 to vector<48x128xf32>
    %161 = arith.mulf %160, %157 : vector<48x128xf32>
    %162 = arith.select %159, %157, %161 : vector<48x128xi1>, vector<48x128xf32>
    %163 = vector.shape_cast %162 : vector<48x128xf32> to vector<2x24x128xf32>
    %164 = vector.extract_strided_slice %163 {offsets = [0, 0, 0], sizes = [2, 16, 128], strides = [1, 1, 1]} : vector<2x24x128xf32> to vector<2x16x128xf32>
    %c0_70 = arith.constant 0 : index
    %c0_71 = arith.constant 0 : index
    %c0_72 = arith.constant 0 : index
    %165 = vector.load %arg7[%c0_70, %c0_71, %c0_72] : memref<2x16x128xf32, #tpu.memory_space<vmem>>, vector<2x16x128xf32>
    tpu.vector_store %arg7[%c0_70, %c0_71, %c0_72], %164 {strides = array<i32>} : memref<2x16x128xf32, #tpu.memory_space<vmem>>, vector<2x16x128xf32>,
    return
  }
}

</mosaic_0001>

<bundles_post_ra>
// kernel: tpu_custom_call.1
= control target key start
LH: loop header
LB: loop body
LE: loop exit
PB: predicated region body
PF: predicated region fallthrough
CT: control target
= control target key end

     0   :  { %12 = vsyncpa [#allocation3], 0  ;;  %s2199_s0 = inlined_call_operand.hbm [shape: f32[2,16,64], index: 0, kind: input, shape index: {}]   ;;  %s2200_s1 = inlined_call_operand.hbm [shape: bf16[3,64,128], index: 1, kind: input, shape index: {}]   ;;  %s2201_s2 = inlined_call_operand.vmem [shape: f32[1,128], index: 2, kind: input, shape index: {}]   ;;  %s2202_s3 = inlined_call_operand.vmem [shape: f32[1,128], index: 3, kind: input, shape index: {}]   ;;  %s2203_s4 = inlined_call_operand.hbm [shape: bf16[3,128,128], index: 4, kind: input, shape index: {}]   ;;  %s2204_s5 = inlined_call_operand.vmem [shape: f32[1,128], index: 5, kind: input, shape index: {}]   ;;  %s2205_s6 = inlined_call_operand.vmem [shape: f32[1,128], index: 6, kind: input, shape index: {}]   ;;  %s2206_s7 = inlined_call_operand.hbm [shape: f32[2,16,128], index: 7, kind: output, shape index: {}]  }
   0x1   :  { %13 = vsyncpa [#allocation6], 0 }
   0x2   :  { %14 = vsyncpa [#allocation4], 0  ;;  %s1668_s24 = smov [#allocation5]   ;;  %s1574_s28 = scalar_lea.hbm %s2200_s1, 1536 }
   0x3   :  { %s32_s25 = sshll.u32 %s1668_s24, 4  ;;  %p1575_p0 = scmp.ne.s32.totalorder %s2200_s1, %s1574_s28  ;;  %s33_s25 = int_to_ptr.vmem [resolvable:$true] %s32_s25 }
   0x4   :  { %p1578_p1 = scmp.lt.u32.totalorder %s1574_s28, %s2200_s1 }
   0x6   :  { %p1580_p2 = pnand %p1578_p1, %p1575_p0 }
   0x8   :  { %1583 = shalt.err (!%p1580_p2)
}
   0x9   :  { %s1584_s10 = scalar_lea.vmem %s33_s25, 1536  ;;  %p1589_p4 = scmp.lt.s32.totalorder %s33_s25, %s33_s25 }
   0xa   :  { %p1585_p3 = scmp.ne.s32.totalorder %s33_s25, %s1584_s10  ;;  %p1590_p5 = scmp.lt.s32.totalorder %s1584_s10, %s1584_s10 }
   0xc   :  { %p1591_p6 = por %p1590_p5, %p1589_p4 }
   0xe   :  { %p1592_p7 = pnand %p1591_p6, %p1585_p3 }
  0x10   :  { %1595 = shalt.err (!%p1592_p7)
}
  0x11   :  { %s1669_s11 = smov 64   ;;  %s1670_s12 = smov 4  }
  0x12   :  { %38 = dma.hbm_to_vmem [thread:$0]  %s2200_s1, 1536, %s33_s25, [#allocation6], %s1669_s11, %s1669_s11, %s1670_s12  }
  0x13   :  { %s1671_s15 = smov [#allocation2]   ;;  %s1596_s19 = scalar_lea.hbm %s2199_s0, 512 }
  0x14   :  { %s20_s16 = sshll.u32 %s1671_s15, 4  ;;  %p1597_p8 = scmp.ne.s32.totalorder %s2199_s0, %s1596_s19  ;;  %s21_s16 = int_to_ptr.vmem [resolvable:$true] %s20_s16 }
  0x15   :  { %p1600_p9 = scmp.lt.u32.totalorder %s1596_s19, %s2199_s0 }
  0x17   :  { %p1602_p10 = pnand %p1600_p9, %p1597_p8 }
  0x19   :  { %1605 = shalt.err (!%p1602_p10)
}
  0x1a   :  { %s1606_s24 = scalar_lea.vmem %s21_s16, 512  ;;  %p1611_p12 = scmp.lt.s32.totalorder %s21_s16, %s21_s16 }
  0x1b   :  { %p1607_p11 = scmp.ne.s32.totalorder %s21_s16, %s1606_s24  ;;  %p1612_p13 = scmp.lt.s32.totalorder %s1606_s24, %s1606_s24 }
  0x1d   :  { %p1613_p0 = por %p1612_p13, %p1611_p12 }
  0x1f   :  { %p1614_p1 = pnand %p1613_p0, %p1607_p11 }
  0x21   :  { %1617 = shalt.err (!%p1614_p1)
}
  0x22   :  { %s1672_s1 = smov 128   ;;  %s1673_s25 = smov 8  }
  0x23   :  { %26 = dma.hbm_to_vmem [thread:$0]  %s2199_s0, 512, %s21_s16, [#allocation3], %s1672_s1, %s1672_s1, %s1673_s25  }
  0x24   :  { %s1674_s28 = smov [#allocation7]   ;;  %s1618_s9 = scalar_lea.hbm %s2203_s4, 3072 }
  0x25   :  { %s48_s29 = sshll.u32 %s1674_s28, 4  ;;  %p1619_p2 = scmp.ne.s32.totalorder %s2203_s4, %s1618_s9  ;;  %s49_s29 = int_to_ptr.vmem [resolvable:$true] %s48_s29 }
  0x26   :  { %p1622_p3 = scmp.lt.u32.totalorder %s1618_s9, %s2203_s4 }
  0x28   :  { %p1624_p4 = pnand %p1622_p3, %p1619_p2 }
  0x2a   :  { %1627 = shalt.err (!%p1624_p4)
}
  0x2b   :  { %s1628_s17 = scalar_lea.vmem %s49_s29, 3072  ;;  %p1633_p6 = scmp.lt.s32.totalorder %s49_s29, %s49_s29 }
  0x2c   :  { %p1629_p5 = scmp.ne.s32.totalorder %s49_s29, %s1628_s17  ;;  %p1634_p7 = scmp.lt.s32.totalorder %s1628_s17, %s1628_s17 }
  0x2e   :  { %p1635_p8 = por %p1634_p7, %p1633_p6 }
  0x30   :  { %p1636_p9 = pnand %p1635_p8, %p1629_p5 }
  0x32   :  { %1639 = shalt.err (!%p1636_p9)
}
  0x33   :  { %54 = dma.hbm_to_vmem [thread:$0]  %s2203_s4, 3072, %s49_s29, [#allocation6], %s1669_s11, %s1669_s11, %s1670_s12  }
  0x34   :  { %1662 = dma.done.wait [#allocation3], 512  }
  0x35   :  { %1663 = vsyncadd [#allocation3], 4294966784 }
  0x36   :  { %1664 = dma.done.wait [#allocation6], 4608  }
  0x37   :  { %1665 = vsyncadd [#allocation6], 4294962688  ;;  %v1675_v0 = vmov 0.0   ;;  %vm1676_vm0 = vmmov 0   ;;  %v1534_v1 = vld [vmem:[#allocation5 + $0x20] sm:$0xff]   ;;  %v1535_v2 = vld [vmem:[#allocation5 + $0x28] sm:$0xff]   ;;  %v69_v7 = vlaneseq }
  0x38   :  { %1306 = vmatprep.subr.bf16.mxu0 %v1675_v0  ;;  %1314 = vmatprep.mubr.msk.bf16.mxu0 %vm1676_vm0, %v1675_v0  ;;  %v1536_v3 = vld [vmem:[#allocation5 + $0x30] sm:$0xff]   ;;  %v1537_v4 = vld [vmem:[#allocation5 + $0x38] sm:$0xff]   ;;  %v1773_v5 = vld [vmem:[#allocation2] sm:$0xff]  ;;  %vm240_vm1 = vcmask 523264   ;;  %s1677_s4 = smov 16   ;;  %s1678_s12 = smov 32  }
  0x39   :  { %1366 = vmatprep.subr.bf16.mxu1 %v1675_v0  ;;  %1382 = vmatprep.mubr.msk.bf16.mxu1 %vm1676_vm0, %v1675_v0  ;;  %v1775_v6 = vld [vmem:[#allocation2 + $0x8] sm:$0xff]  ;;  %v1538_v9 = vld [vmem:[#allocation5] sm:$0xff]   ;;  %v1781_v11 = vshrl.u32 %v69_v7, 7  ;;  %v1784_v12 = vld [vmem:[#allocation2 + $0x10] sm:$0xff]  ;;  %v182_v13 = vrot.slane %v1773_v5, 7  ;;  %v397_v35 = vrot.slane %v1773_v5, 1 }
  0x3a   :  { %1307 = vmatpush3.bf16.msra.mxu0 %v1534_v1  ;;  %v204_v8 = vpack.c.bf16 %v1775_v6, %v1773_v5  ;;  %v1539_v10 = vld [vmem:[#allocation5 + $0x8] sm:$0xff]   ;;  %v183_v14 = vrot.slane %v1775_v6, 7  ;;  %v1540_v15 = vld [vmem:[#allocation5 + $0x10] sm:$0xff]   ;;  %v205_v16 = vpack.c.bf16 %v1784_v12, %v1675_v0  ;;  %v181_v17 = vld [vmem:[#allocation2 + $0x18] sm:$0xff]  ;;  %v184_v24 = vrot.slane %v1784_v12, 7 }
  0x3b   :  { %1308 = vmatprep.subr.bf16.mxu0 %v1675_v0  ;;  %vm186_vm2 = vcmp.lt.s32.totalorder %v1781_v11, 1  ;;  %v1541_v18 = vld [vmem:[#allocation5 + $0x18] sm:$0xff]   ;;  %v206_v19 = vpack.c.bf16 %v1675_v0, %v181_v17  ;;  %v1542_v23 = vld [vmem:[#allocation5 + $0x40] sm:$0xff]   ;;  %v1543_v25 = vld [vmem:[#allocation5 + $0x48] sm:$0xff]   ;;  %v185_v30 = vrot.slane %v181_v17, 7  ;;  %v398_v36 = vrot.slane %v1775_v6, 1 }
  0x3c   :  { %v191_v20 = vsel %vm186_vm2, %v182_v13, %v183_v14  ;;  %v192_v21 = vsel %vm186_vm2, 0.0, %v182_v13  ;;  %v189_v26 = vsel %vm186_vm2, 0.0, %v184_v24  ;;  %v190_v27 = vsel %vm186_vm2, %v183_v14, 0.0  ;;  %v1544_v29 = vld [vmem:[#allocation5 + $0x50] sm:$0xff]   ;;  %v1545_v33 = vld [vmem:[#allocation5 + $0x58] sm:$0xff]  }
  0x3d   :  { %v193_v22 = vpack.c.bf16 %v191_v20, %v192_v21  ;;  %v194_v28 = vpack.c.bf16 %v189_v26, %v190_v27  ;;  %v187_v31 = vsel %vm186_vm2, %v185_v30, 0.0  ;;  %v188_v32 = vsel %vm186_vm2, %v184_v24, %v185_v30 }
  0x3e   :  { %1309 = vmatpush3.bf16.msra.mxu0 %v1535_v2  ;;  %v195_v34 = vpack.c.bf16 %v187_v31, %v188_v32  ;;  %vm401_vm3 = vcmp.lt.s32.totalorder %v1781_v11, 7  ;;  %v400_v40 = vrot.slane %v181_v17, 1  ;;  %v399_v41 = vrot.slane %v1784_v12, 1 }
  0x3f   :  { %1310 = vmatprep.subr.bf16.mxu0 %v1675_v0  ;;  %v405_v37 = vsel %vm401_vm3, %v398_v36, 0.0  ;;  %v406_v38 = vsel %vm401_vm3, %v397_v35, %v398_v36  ;;  %v407_v46 = vsel %vm401_vm3, 0.0, %v397_v35  ;;  %v71_v48 = vadd.s32 8, %v1781_v11 }
  0x40   :  { %v408_v39 = vpack.c.bf16 %v405_v37, %v406_v38  ;;  %v403_v42 = vsel %vm401_vm3, %v399_v41, %v400_v40  ;;  %v404_v43 = vsel %vm401_vm3, 0.0, %v399_v41  ;;  %v402_v45 = vsel %vm401_vm3, %v400_v40, 0.0 }
  0x41   :  { %v409_v44 = vpack.c.bf16 %v403_v42, %v404_v43  ;;  %v410_v47 = vpack.c.bf16 %v407_v46, %v402_v45  ;;  %v1857_v49 = vmul.u32.u64.low 2863311531, %v1781_v11  ;;  %v1858_v50 = vmul.u32.u64.high 2863311531, %v1781_v11, %v1857_v49 }
  0x42   :  { %1311 = vmatpush3.bf16.msra.mxu0 %v1536_v3  ;;  %v1860_v51 = vmul.u32.u64.low 2863311531, %v71_v48  ;;  %v1861_v52 = vmul.u32.u64.high 2863311531, %v71_v48, %v1860_v51  ;;  %v72_v53 = vadd.s32 16, %v1781_v11  ;;  %v73_v54 = vadd.s32 24, %v1781_v11 }
  0x43   :  { %1312 = vmatprep.subr.bf16.mxu0 %v1675_v0  ;;  %v82_v57 = vshrl.u32 %v1858_v50, 4  ;;  %v74_v61 = vadd.s32 32, %v1781_v11  ;;  %v75_v1 = vadd.s32 40, %v1781_v11  ;;  %v1939_v14 = vsub.s32 0, %v1781_v11 }
  0x44   :  { %v1865_v55 = vmul.u32.u64.low 2863311531, %v72_v53  ;;  %v1866_v56 = vmul.u32.u64.high 2863311531, %v72_v53, %v1865_v55  ;;  %v93_v58 = vshrl.u32 %v1861_v52, 4 }
  0x45   :  { %v1870_v59 = vmul.u32.u64.low 2863311531, %v73_v54  ;;  %v1871_v60 = vmul.u32.u64.high 2863311531, %v73_v54, %v1870_v59  ;;  %v83_v62 = vmul.u32 24, %v82_v57 }
  0x46   :  { %1313 = vmatpush3.bf16.msra.mxu0 %v1537_v4  ;;  %v94_v63 = vmul.u32 24, %v93_v58  ;;  %v104_v2 = vshrl.u32 %v1866_v56, 4  ;;  %v1876_v3 = vmul.u32.u64.low 2863311531, %v74_v61  ;;  %v1877_v4 = vmul.u32.u64.high 2863311531, %v74_v61, %v1876_v3 }
  0x47   :  { %1326 = vmatprep.subr.bf16.mxu0 %v1675_v0  ;;  %v84_v5 = vsub.s32 %v1781_v11, %v83_v62  ;;  %v115_v7 = vshrl.u32 %v1871_v60, 4 }
  0x48   :  { %v95_v6 = vsub.s32 %v71_v48, %v94_v63  ;;  %v126_v17 = vshrl.u32 %v1877_v4, 4 }
  0x49   :  { %1315 = vmatmul.mubr.msk.bf16.vlgmr.msra.gmra.mrb[0].mxu0 %vm240_vm1, %v204_v8  ;;  %vm142_vm4 = vcmp.ne.s32.totalorder %v84_v5, 0  ;;  %vm148_vm5 = vcmp.lt.s32.totalorder %v84_v5, 0  ;;  %v116_v12 = vmul.u32 24, %v115_v7  ;;  %v160_v13 = vadd.s32 24, %v84_v5 }
  0x4a   :  { %1327 = vmatpush3.bf16.msra.mxu0 %v1538_v9  ;;  %1318 = vmatprep.mubr.msk.bf16.mxu0 %vm1676_vm0, %v1675_v0  ;;  %v1881_v8 = vmul.u32.u64.low 2863311531, %v75_v1  ;;  %v1882_v9 = vmul.u32.u64.high 2863311531, %v75_v1, %v1881_v8  ;;  %vm143_vm6 = vcmp.ne.s32.totalorder %v95_v6, 0  ;;  %vm149_vm7 = vcmp.lt.s32.totalorder %v95_v6, 0  ;;  %vm1884_vm8 = vmand %vm148_vm5, %vm142_vm4 }
  0x4b   :  { %1328 = vmatprep.subr.bf16.mxu0 %v1675_v0  ;;  %vm155_vm9 = vmand %vm149_vm7, %vm143_vm6  ;;  %v166_v20 = vsel %vm1884_vm8, %v160_v13, %v84_v5 }
  0x4c   :  { %vm1892_vm14 = vcmp.lt.s32.totalorder %v166_v20, 16 }
  0x4e   :  { %1329 = vmatpush3.bf16.msra.mxu0 %v1539_v10  ;;  %v105_v10 = vmul.u32 24, %v104_v2 }
  0x4f   :  { %1330 = vmatprep.subr.bf16.mxu0 %v1675_v0 }
  0x51   :  { %1319 = vmatmul.mubr.msk.bf16.gmra.mrb[4].mxu0 %vm240_vm1, %v205_v16  ;;  %v106_v16 = vsub.s32 %v72_v53, %v105_v10 }
  0x52   :  { %1331 = vmatpush3.bf16.msra.mxu0 %v1540_v15  ;;  %1322 = vmatprep.mubr.msk.bf16.mxu0 %vm1676_vm0, %v1675_v0  ;;  %v161_v15 = vadd.s32 24, %v95_v6 }
  0x53   :  { %1332 = vmatprep.subr.bf16.mxu0 %v1675_v0  ;;  %vm144_vm10 = vcmp.ne.s32.totalorder %v106_v16, 0  ;;  %vm150_vm11 = vcmp.lt.s32.totalorder %v106_v16, 0 }
  0x54   :  { %v167_v21 = vsel %vm155_vm9, %v161_v15, %v95_v6 }
  0x55   :  { %vm1898_vm15 = vcmp.lt.s32.totalorder %v167_v21, 16 }
  0x56   :  { %1333 = vmatpush3.bf16.msra.mxu0 %v1541_v18  ;;  %v117_v18 = vsub.s32 %v73_v54, %v116_v12 }
  0x57   :  { %1346 = vmatprep.subr.bf16.mxu0 %v1675_v0 }
  0x58   :  { %vm145_vm12 = vcmp.ne.s32.totalorder %v117_v18, 0  ;;  %vm151_vm13 = vcmp.lt.s32.totalorder %v117_v18, 0 }
  0x59   :  { %1323 = vmatmul.mubr.msk.bf16.gmra.mrb[8].mxu0 %vm240_vm1, %v206_v19  ;;  %v137_v19 = vshrl.u32 %v1882_v9, 4  ;;  %vm157_vm4 = vmand %vm151_vm13, %vm145_vm12 }
  0x5a   :  { %1334 = vmatprep.mubr.msk.bf16.mxu0 %vm1676_vm0, %v1675_v0 }
  0x5b   :  { %v138_v24 = vmul.u32 24, %v137_v19 }
  0x5d   :  { %v139_v36 = vsub.s32 %v75_v1, %v138_v24 }
  0x5f   :  { %vm147_vm8 = vcmp.ne.s32.totalorder %v139_v36, 0  ;;  %vm153_vm9 = vcmp.lt.s32.totalorder %v139_v36, 0  ;;  %v165_v45 = vadd.s32 24, %v139_v36 }
  0x60   :  { %vm159_vm12 = vmand %vm153_vm9, %vm147_vm8 }
  0x61   :  { %1335 = vmatmul.mubr.msk.bf16.vlgmr.msra.gmra.mrb[0].mxu0 %vm240_vm1, %v193_v22  ;;  %v127_v22 = vmul.u32 24, %v126_v17  ;;  %v171_v52 = vsel %vm159_vm12, %v165_v45, %v139_v36  ;;  %vm1226_vm9 = vmpackc.low %vm1898_vm15, %vm1892_vm14 }
  0x62   :  { %1347 = vmatpush3.bf16.msra.mxu0 %v1542_v23  ;;  %1338 = vmatprep.mubr.msk.bf16.mxu0 %vm1676_vm0, %v1675_v0  ;;  %v162_v23 = vadd.s32 24, %v106_v16 }
  0x63   :  { %1348 = vmatprep.subr.bf16.mxu0 %v1675_v0  ;;  %v128_v30 = vsub.s32 %v74_v61, %v127_v22 }
  0x65   :  { %vm146_vm5 = vcmp.ne.s32.totalorder %v128_v30, 0  ;;  %vm152_vm6 = vcmp.lt.s32.totalorder %v128_v30, 0  ;;  %v164_v40 = vadd.s32 24, %v128_v30 }
  0x66   :  { %1349 = vmatpush3.bf16.msra.mxu0 %v1543_v25 }
  0x67   :  { %1350 = vmatprep.subr.bf16.mxu0 %v1675_v0 }
  0x69   :  { %1339 = vmatmul.mubr.msk.bf16.gmra.mrb[4].mxu0 %vm240_vm1, %v194_v28 }
  0x6a   :  { %1351 = vmatpush3.bf16.msra.mxu0 %v1544_v29  ;;  %1342 = vmatprep.mubr.msk.bf16.mxu0 %vm1676_vm0, %v1675_v0  ;;  %v163_v29 = vadd.s32 24, %v117_v18 }
  0x6b   :  { %1352 = vmatprep.subr.bf16.mxu0 %v1675_v0 }
  0x6c   :  { %v169_v38 = vsel %vm157_vm4, %v163_v29, %v117_v18 }
  0x6e   :  { %1353 = vmatpush3.bf16.msra.mxu0 %v1545_v33 }
  0x6f   :  { %1422 = vmatprep.subr.bf16.mxu0 %v1675_v0 }
  0x71   :  { %1343 = vmatmul.mubr.msk.bf16.gmra.mrb[8].mxu0 %vm240_vm1, %v195_v34 }
  0x72   :  { %1354 = vmatprep.mubr.msk.bf16.mxu0 %vm1676_vm0, %v1675_v0 }
  0x79   :  { %1355 = vmatmul.mubr.msk.bf16.vlgmr.msra.gmra.mrb[0].mxu0 %vm240_vm1, %v408_v39 }
  0x7a   :  { %1358 = vmatprep.mubr.msk.bf16.mxu0 %vm1676_vm0, %v1675_v0 }
  0x81   :  { %1359 = vmatmul.mubr.msk.bf16.gmra.mrb[4].mxu0 %vm240_vm1, %v409_v44 }
  0x82   :  { %1362 = vmatprep.mubr.msk.bf16.mxu0 %vm1676_vm0, %v1675_v0 }
  0x89   :  { %1363 = vmatmul.mubr.msk.bf16.gmra.mrb[8].mxu0 %vm240_vm1, %v410_v47  ;;  %vm156_vm1 = vmand %vm150_vm11, %vm144_vm10  ;;  %vm1914_vm10 = vcmp.lt.s32.totalorder %v169_v38, 16 }
  0x8a   :  { %1438 = vmatprep.mubr.msk.bf16.mxu0 %vm1676_vm0, %v1675_v0  ;;  %v168_v35 = vsel %vm156_vm1, %v162_v23, %v106_v16  ;;  %vm158_vm11 = vmand %vm152_vm6, %vm146_vm5  ;;  %vm1926_vm1 = vcmp.lt.s32.totalorder %v171_v52, 16 }
  0x8b   :  { %vm1910_vm7 = vcmp.lt.s32.totalorder %v168_v35, 16  ;;  %v170_v50 = vsel %vm158_vm11, %v164_v40, %v128_v30 }
  0x8c   :  { %vm1922_vm13 = vcmp.lt.s32.totalorder %v170_v50, 16  ;;  %vm1229_vm12 = vmpackc.low %vm1914_vm10, %vm1910_vm7 }
 0x14c   :  { %v1896_v26 = vpop.f32.mrb[0].mxu0 }
 0x14d   :  { %v1356_v28 = vpop.f32.mrb[1].mxu0  ;;  %v528_v32 = vsel %vm1892_vm14, %v1896_v26, 0.0 }
 0x14e   :  { %v1902_v31 = vpop.f32.mrb[2].mxu0 }
 0x14f   :  { %v529_v33 = vsel %vm1898_vm15, %v1902_v31, 0.0  ;;  %v1357_v34 = vpop.f32.mrb[3].mxu0 }
 0x150   :  { %v534_v37 = vadd.f32 %v529_v33, %v528_v32 }
 0x154   :  { %v495_v41 = vpop.f32.mrb[4].mxu0 }
 0x155   :  { %v530_v43 = vsel %vm1910_vm7, %v495_v41, 0.0  ;;  %v1360_v44 = vpop.f32.mrb[5].mxu0 }
 0x156   :  { %v535_v46 = vadd.f32 %v534_v37, %v530_v43  ;;  %v498_v47 = vpop.f32.mrb[6].mxu0 }
 0x157   :  { %v531_v48 = vsel %vm1914_vm10, %v498_v47, 0.0  ;;  %v1361_v49 = vpop.f32.mrb[7].mxu0 }
 0x158   :  { %v536_v51 = vadd.f32 %v535_v46, %v531_v48 }
 0x15c   :  { %v503_v54 = vpop.f32.mrb[8].mxu0 }
 0x15d   :  { %v532_v56 = vsel %vm1922_vm13, %v503_v54, 0.0  ;;  %v1364_v57 = vpop.f32.mrb[9].mxu0 }
 0x15e   :  { %v537_v58 = vadd.f32 %v536_v51, %v532_v56  ;;  %v506_v59 = vpop.f32.mrb[10].mxu0 }
 0x15f   :  { %v533_v60 = vsel %vm1926_vm1, %v506_v59, 0.0  ;;  %v1365_v61 = vpop.f32.mrb[11].mxu0 }
 0x160   :  { %v538_v62 = vadd.f32 %v537_v58, %v533_v60  ;;  %v1547_v58 = vld [vmem:[#allocation7 + $0x48] sm:$0xff]   ;;  %v1549_v60 = vld [vmem:[#allocation7 + $0x50] sm:$0xff]  }
 0x161   :  { %v1983_v61 = vld [vmem:[#allocation7 + $0x88] sm:$0xff]  }
 0x162   :  { %v539_v63 = vrot.slane %v538_v62, 4 }
 0x164   :  { %v540_v1 = vadd.f32 %v539_v63, %v538_v62  ;;  %v1551_v62 = vld [vmem:[#allocation7 + $0x58] sm:$0xff]  }
 0x166   :  { %v541_v2 = vrot.slane %v540_v1, 2 }
 0x168   :  { %v542_v3 = vadd.f32 %v541_v2, %v540_v1  ;;  %v1988_v1 = vld [vmem:[#allocation7 + $0x90] sm:$0xff]  }
 0x16a   :  { %v543_v4 = vrot.slane %v542_v3, 1 }
 0x16c   :  { %v544_v5 = vadd.f32 %v543_v4, %v542_v3  ;;  %v1553_v3 = vld [vmem:[#allocation7 + $0x60] sm:$0xff]   ;;  %v1994_v4 = vld [vmem:[#allocation7 + $0x98] sm:$0xff]  }
 0x16e   :  { %545 = vrot.lane.b32.xlu0 %v544_v5, %s1673_s25 }
 0x1e0   :  { %v546_v6 = vpop.permute.xlu0 %545 }
 0x1e1   :  { %v547_v7 = vadd.f32 %v546_v6, %v544_v5  ;;  %v1555_v5 = vld [vmem:[#allocation7 + $0x68] sm:$0xff]   ;;  %v1999_v6 = vld [vmem:[#allocation7 + $0xa0] sm:$0xff]  }
 0x1e3   :  { %548 = vrot.lane.b32.xlu0 %v547_v7, %s1677_s4 }
 0x255   :  { %v549_v8 = vpop.permute.xlu0 %548 }
 0x256   :  { %v550_v9 = vadd.f32 %v549_v8, %v547_v7  ;;  %v1557_v7 = vld [vmem:[#allocation7 + $0x70] sm:$0xff]   ;;  %v2003_v8 = vld [vmem:[#allocation7 + $0xa8] sm:$0xff]  }
 0x258   :  { %551 = vrot.lane.b32.xlu1 %v550_v9, %s1678_s12 }
 0x2ca   :  { %v552_v10 = vpop.permute.xlu1 %551 }
 0x2cb   :  { %v553_v12 = vadd.f32 %v552_v10, %v550_v9  ;;  %v1559_v9 = vld [vmem:[#allocation7 + $0x78] sm:$0xff]   ;;  %v2008_v10 = vld [vmem:[#allocation7 + $0xb0] sm:$0xff]  }
 0x2cd   :  { %554 = vrot.lane.b32.xlu1 %v553_v12, %s1669_s11 }
 0x33f   :  { %v555_v13 = vpop.permute.xlu1 %554 }
 0x340   :  { %v556_v15 = vadd.f32 %v555_v13, %v553_v12  ;;  %v2014_v12 = vld [vmem:[#allocation7 + $0xb8] sm:$0xff]  }
 0x342   :  { %v557_v16 = vmul.f32 0.001953125, %v556_v15 }
 0x344   :  { %v561_v17 = vrot.slane %v557_v16, %v1939_v14 }
 0x346   :  { %v1943_v18 = vsub.f32 %v1896_v26, %v561_v17  ;;  %v1946_v19 = vsub.f32 %v1902_v31, %v561_v17  ;;  %v1948_v20 = vsub.f32 %v495_v41, %v561_v17  ;;  %v1950_v21 = vsub.f32 %v498_v47, %v561_v17 }
 0x347   :  { %v1952_v22 = vsub.f32 %v503_v54, %v561_v17  ;;  %v1963_v30 = vsub.f32 %v506_v59, %v561_v17  ;;  %v1546_v54 = vld [vmem:[#allocation7 + $0x40] sm:$0xff]  }
 0x348   :  { %v568_v23 = vsel %vm1892_vm14, %v1943_v18, 0.0  ;;  %v569_v24 = vsel %vm1898_vm15, %v1946_v19, 0.0  ;;  %v570_v26 = vsel %vm1910_vm7, %v1948_v20, 0.0  ;;  %v571_v31 = vsel %vm1914_vm10, %v1950_v21, 0.0  ;;  %1367 = vmatpush3.bf16.msra.mxu1 %v1546_v54  ;;  %v1978_v59 = vld [vmem:[#allocation7 + $0x80] sm:$0xff]  }
 0x349   :  { %v574_v28 = vmul.f32 %v568_v23, %v568_v23  ;;  %v575_v29 = vmul.f32 %v569_v24, %v569_v24  ;;  %v576_v32 = vmul.f32 %v570_v26, %v570_v26  ;;  %v572_v34 = vsel %vm1922_vm13, %v1952_v22, 0.0  ;;  %1368 = vmatprep.subr.bf16.mxu1 %v1675_v0  ;;  %1423 = vmatpush3.bf16.msra.mxu0 %v1978_v59  ;;  %v604_v23 = vld [vmem:[%s2201_s2] sm:$0x1] }
 0x34a   :  { %v577_v35 = vmul.f32 %v571_v31, %v571_v31  ;;  %v573_v37 = vsel %vm1926_vm1, %v1963_v30, 0.0  ;;  %v578_v38 = vmul.f32 %v572_v34, %v572_v34  ;;  %1424 = vmatprep.subr.bf16.mxu0 %v1675_v0 }
 0x34b   :  { %v580_v33 = vadd.f32 %v575_v29, %v574_v28  ;;  %v579_v41 = vmul.f32 %v573_v37, %v573_v37  ;;  %v1217_v29 = vld [vmem:[%s2202_s3] ss:$0 sm:$0xff] }
 0x34c   :  { %1369 = vmatpush3.bf16.msra.mxu1 %v1547_v58  ;;  %v1563_v58 = vld [vmem:[#allocation7 + $0x8] sm:$0xff]  }
 0x34d   :  { %v581_v36 = vadd.f32 %v580_v33, %v576_v32  ;;  %1370 = vmatprep.subr.bf16.mxu1 %v1675_v0  ;;  %1425 = vmatpush3.bf16.msra.mxu0 %v1983_v61 }
 0x34e   :  { %1426 = vmatprep.subr.bf16.mxu0 %v1675_v0 }
 0x34f   :  { %v582_v40 = vadd.f32 %v581_v36, %v577_v35 }
 0x350   :  { %1371 = vmatpush3.bf16.msra.mxu1 %v1549_v60 }
 0x351   :  { %v583_v43 = vadd.f32 %v582_v40, %v578_v38  ;;  %1372 = vmatprep.subr.bf16.mxu1 %v1675_v0  ;;  %1427 = vmatpush3.bf16.msra.mxu0 %v1988_v1 }
 0x352   :  { %1428 = vmatprep.subr.bf16.mxu0 %v1675_v0 }
 0x353   :  { %v584_v44 = vadd.f32 %v583_v43, %v579_v41 }
 0x354   :  { %1373 = vmatpush3.bf16.msra.mxu1 %v1551_v62 }
 0x355   :  { %v585_v45 = vrot.slane %v584_v44, 4  ;;  %1374 = vmatprep.subr.bf16.mxu1 %v1675_v0  ;;  %1429 = vmatpush3.bf16.msra.mxu0 %v1994_v4 }
 0x356   :  { %1430 = vmatprep.subr.bf16.mxu0 %v1675_v0 }
 0x357   :  { %v586_v46 = vadd.f32 %v585_v45, %v584_v44 }
 0x358   :  { %1375 = vmatpush3.bf16.msra.mxu1 %v1553_v3 }
 0x359   :  { %v587_v47 = vrot.slane %v586_v46, 2  ;;  %1376 = vmatprep.subr.bf16.mxu1 %v1675_v0  ;;  %1431 = vmatpush3.bf16.msra.mxu0 %v1999_v6 }
 0x35a   :  { %1432 = vmatprep.subr.bf16.mxu0 %v1675_v0 }
 0x35b   :  { %v588_v48 = vadd.f32 %v587_v47, %v586_v46 }
 0x35c   :  { %1377 = vmatpush3.bf16.msra.mxu1 %v1555_v5 }
 0x35d   :  { %v589_v49 = vrot.slane %v588_v48, 1  ;;  %1378 = vmatprep.subr.bf16.mxu1 %v1675_v0  ;;  %1433 = vmatpush3.bf16.msra.mxu0 %v2003_v8 }
 0x35e   :  { %1434 = vmatprep.subr.bf16.mxu0 %v1675_v0 }
 0x35f   :  { %v590_v50 = vadd.f32 %v589_v49, %v588_v48 }
 0x360   :  { %1379 = vmatpush3.bf16.msra.mxu1 %v1557_v7  ;;  %v1564_v7 = vld [vmem:[#allocation7 + $0x10] sm:$0xff]  }
 0x361   :  { %591 = vrot.lane.b32.xlu0 %v590_v50, %s1673_s25  ;;  %1380 = vmatprep.subr.bf16.mxu1 %v1675_v0 }
 0x362   :  { %1435 = vmatpush3.bf16.msra.mxu0 %v2008_v10 }
 0x363   :  { %1436 = vmatprep.subr.bf16.mxu0 %v1675_v0 }
 0x364   :  { %1381 = vmatpush3.bf16.msra.mxu1 %v1559_v9 }
 0x365   :  { %1394 = vmatprep.subr.bf16.mxu1 %v1675_v0 }
 0x366   :  { %1437 = vmatpush3.bf16.msra.mxu0 %v2014_v12 }
 0x3d3   :  { %v592_v51 = vpop.permute.xlu0 %591 }
 0x3d4   :  { %v593_v52 = vadd.f32 %v592_v51, %v590_v50 }
 0x3d6   :  { %594 = vrot.lane.b32.xlu1 %v593_v52, %s1677_s4 }
 0x448   :  { %v595_v56 = vpop.permute.xlu1 %594 }
 0x449   :  { %v596_v57 = vadd.f32 %v595_v56, %v593_v52 }
 0x44b   :  { %597 = vrot.lane.b32.xlu0 %v596_v57, %s1678_s12 }
 0x4bd   :  { %v598_v63 = vpop.permute.xlu0 %597 }
 0x4be   :  { %v599_v2 = vadd.f32 %v598_v63, %v596_v57 }
 0x4c0   :  { %600 = vrot.lane.b32.xlu1 %v599_v2, %s1669_s11 }
 0x532   :  { %v601_v13 = vpop.permute.xlu1 %600 }
 0x533   :  { %v602_v15 = vadd.f32 %v601_v13, %v599_v2 }
 0x535   :  { %v603_v16 = vmul.f32 0.001953125, %v602_v15 }
 0x537   :  { %v605_v17 = vadd.f32 1e-05, %v603_v16 }
 0x539   :  { %1570 = vrsqrt.f32 %v605_v17  ;;  %v1565_v17 = vld [vmem:[#allocation7 + $0x18] sm:$0xff]  }
 0x543   :  { %v1571_v24 = vpop.eup %1570 }
 0x544   :  { %v607_v26 = vmul.f32 %v1571_v24, %v604_v23 }
 0x546   :  { %v612_v28 = vrot.slane %v607_v26, %v1939_v14 }
 0x548   :  { %v614_v31 = vmul.f32 %v612_v28, %v1943_v18  ;;  %v615_v32 = vmul.f32 %v612_v28, %v1946_v19  ;;  %v616_v33 = vmul.f32 %v612_v28, %v1948_v20  ;;  %v617_v34 = vmul.f32 %v612_v28, %v1950_v21  ;;  %v1561_v20 = vld [vmem:[#allocation7] sm:$0xff]  }
 0x549   :  { %v618_v35 = vmul.f32 %v612_v28, %v1952_v22  ;;  %v619_v52 = vmul.f32 %v612_v28, %v1963_v30 }
 0x54a   :  { %v627_v36 = vadd.f32 %v1217_v29, %v614_v31  ;;  %v628_v37 = vadd.f32 %v1217_v29, %v615_v32  ;;  %v629_v38 = vadd.f32 %v1217_v29, %v616_v33  ;;  %v630_v40 = vadd.f32 %v1217_v29, %v617_v34  ;;  %v1567_v32 = vld [vmem:[#allocation7 + $0x28] sm:$0xff]   ;;  %v1568_v34 = vld [vmem:[#allocation7 + $0x30] sm:$0xff]  }
 0x54b   :  { %v631_v41 = vadd.f32 %v1217_v29, %v618_v35  ;;  %v632_v3 = vadd.f32 %v1217_v29, %v619_v52  ;;  %v1566_v29 = vld [vmem:[#allocation7 + $0x20] sm:$0xff]  }
 0x54c   :  { %vm633_vm4 = vcmp.gt.f32.partialorder %v627_v36, 0.0  ;;  %vm634_vm5 = vcmp.gt.f32.partialorder %v628_v37, 0.0  ;;  %v639_v43 = vmul.f32 0.2, %v627_v36  ;;  %v640_v44 = vmul.f32 0.2, %v628_v37 }
 0x54d   :  { %vm635_vm6 = vcmp.gt.f32.partialorder %v629_v38, 0.0  ;;  %v641_v45 = vmul.f32 0.2, %v629_v38  ;;  %vm636_vm8 = vcmp.gt.f32.partialorder %v630_v40, 0.0  ;;  %v642_v18 = vmul.f32 0.2, %v630_v40 }
 0x54e   :  { %v645_v19 = vsel %vm633_vm4, %v627_v36, %v639_v43  ;;  %v646_v46 = vsel %vm634_vm5, %v628_v37, %v640_v44  ;;  %vm637_vm11 = vcmp.gt.f32.partialorder %v631_v41, 0.0  ;;  %v643_v21 = vmul.f32 0.2, %v631_v41  ;;  %vm1232_vm5 = vmpackc.low %vm1926_vm1, %vm1922_vm13 }
 0x54f   :  { %v2035_v22 = vsel %vm1892_vm14, %v645_v19, 0.0  ;;  %v2039_v47 = vsel %vm1898_vm15, %v646_v46, 0.0  ;;  %v1227_v48 = vpack.c.bf16 %v646_v46, %v645_v19  ;;  %v647_v49 = vsel %vm635_vm6, %v629_v38, %v641_v45  ;;  %v1569_v38 = vld [vmem:[#allocation7 + $0x38] sm:$0xff]  }
 0x550   :  { %v918_v50 = vrot.slane %v2035_v22, 1  ;;  %v919_v51 = vrot.slane %v2039_v47, 1  ;;  %v2046_v54 = vsel %vm1910_vm7, %v647_v49, 0.0  ;;  %v648_v56 = vsel %vm636_vm8, %v630_v40, %v642_v18 }
 0x551   :  { %1383 = vmatmul.mubr.msk.bf16.vlgmr.msra.gmra.mrb[0].mxu1 %vm1226_vm9, %v1227_v48  ;;  %v649_v57 = vsel %vm637_vm11, %v631_v41, %v643_v21  ;;  %v920_v60 = vrot.slane %v2046_v54, 1  ;;  %v2059_v30 = vsel %vm1914_vm10, %v648_v56, 0.0  ;;  %v1230_v15 = vpack.c.bf16 %v648_v56, %v647_v49 }
 0x552   :  { %1395 = vmatpush3.bf16.msra.mxu1 %v1561_v20  ;;  %v928_v62 = vsel %vm401_vm3, %v918_v50, %v919_v51  ;;  %1386 = vmatprep.mubr.msk.bf16.mxu1 %vm1676_vm0, %v1675_v0  ;;  %v2063_v63 = vsel %vm1922_vm13, %v649_v57, 0.0  ;;  %v921_v9 = vrot.slane %v2059_v30, 1  ;;  %v644_v16 = vmul.f32 0.2, %v632_v3 }
 0x553   :  { %1396 = vmatprep.subr.bf16.mxu1 %v1675_v0  ;;  %v927_v2 = vsel %vm401_vm3, %v919_v51, %v920_v60  ;;  %v922_v13 = vrot.slane %v2063_v63, 1  ;;  %vm638_vm4 = vcmp.gt.f32.partialorder %v632_v3, 0.0  ;;  %v657_v35 = vrot.slane %v2035_v22, 7 }
 0x554   :  { %v930_v5 = vpack.c.bf16 %v927_v2, %v928_v62  ;;  %v926_v24 = vsel %vm401_vm3, %v920_v60, %v921_v9  ;;  %v650_v26 = vsel %vm638_vm4, %v632_v3, %v644_v16  ;;  %v658_v36 = vrot.slane %v2039_v47, 7 }
 0x555   :  { %v925_v23 = vsel %vm401_vm3, %v921_v9, %v922_v13  ;;  %v1233_v31 = vpack.c.bf16 %v650_v26, %v649_v57  ;;  %v656_v33 = vsel %vm1926_vm1, %v650_v26, 0.0  ;;  %v659_v44 = vrot.slane %v2046_v54, 7 }
 0x556   :  { %1397 = vmatpush3.bf16.msra.mxu1 %v1563_v58  ;;  %1439 = vmatmul.mubr.bf16.vlgmr.msra.gmra.mrb[12].mxu0 %v930_v5  ;;  %v931_v28 = vpack.c.bf16 %v925_v23, %v926_v24  ;;  %v662_v37 = vrot.slane %v656_v33, 7  ;;  %v667_v40 = vsel %vm186_vm2, %v657_v35, %v658_v36  ;;  %v660_v45 = vrot.slane %v2059_v30, 7 }
 0x557   :  { %1398 = vmatprep.subr.bf16.mxu1 %v1675_v0  ;;  %1442 = vmatprep.mubr.msk.bf16.mxu0 %vm1676_vm0, %v1675_v0  ;;  %v666_v19 = vsel %vm186_vm2, %v658_v36, %v659_v44  ;;  %v661_v20 = vrot.slane %v2063_v63, 7 }
 0x558   :  { %v668_v41 = vsel %vm186_vm2, %v662_v37, %v657_v35  ;;  %v665_v18 = vsel %vm186_vm2, %v659_v44, %v660_v45 }
 0x559   :  { %1387 = vmatmul.mubr.msk.bf16.gmra.mrb[4].mxu1 %vm1229_vm12, %v1230_v15  ;;  %v669_v43 = vpack.c.bf16 %v667_v40, %v668_v41  ;;  %v670_v46 = vpack.c.bf16 %v665_v18, %v666_v19  ;;  %v664_v21 = vsel %vm186_vm2, %v660_v45, %v661_v20 }
 0x55a   :  { %1399 = vmatpush3.bf16.msra.mxu1 %v1564_v7  ;;  %1390 = vmatprep.mubr.msk.bf16.mxu1 %vm1676_vm0, %v1675_v0 }
 0x55b   :  { %1400 = vmatprep.subr.bf16.mxu1 %v1675_v0 }
 0x55e   :  { %1401 = vmatpush3.bf16.msra.mxu1 %v1565_v17  ;;  %1443 = vmatmul.mubr.bf16.gmra.mrb[16].mxu0 %v931_v28 }
 0x55f   :  { %1402 = vmatprep.subr.bf16.mxu1 %v1675_v0 }
 0x561   :  { %1391 = vmatmul.mubr.msk.bf16.gmra.mrb[8].mxu1 %vm1232_vm5, %v1233_v31 }
 0x562   :  { %1403 = vmatpush3.bf16.msra.mxu1 %v1566_v29  ;;  %1410 = vmatprep.mubr.msk.bf16.mxu1 %vm1676_vm0, %v1675_v0 }
 0x563   :  { %1404 = vmatprep.subr.bf16.mxu1 %v1675_v0 }
 0x566   :  { %1405 = vmatpush3.bf16.msra.mxu1 %v1567_v32 }
 0x567   :  { %1406 = vmatprep.subr.bf16.mxu1 %v1675_v0 }
 0x56a   :  { %1407 = vmatpush3.bf16.msra.mxu1 %v1568_v34 }
 0x56b   :  { %1408 = vmatprep.subr.bf16.mxu1 %v1675_v0 }
 0x56e   :  { %1409 = vmatpush3.bf16.msra.mxu1 %v1569_v38 }
 0x56f   :  { %1450 = vmatprep.subr.bf16.mxu1 %v1675_v0 }
 0x571   :  { %1411 = vmatmul.mubr.bf16.vlgmr.msra.gmra.mrb[0].mxu1 %v669_v43 }
 0x572   :  { %1458 = vmatpush3.bf16.msra.mxu1 %v1978_v59  ;;  %1414 = vmatprep.mubr.msk.bf16.mxu1 %vm1676_vm0, %v1675_v0  ;;  %v663_v59 = vsel %vm186_vm2, %v661_v20, %v662_v37 }
 0x573   :  { %1451 = vmatprep.subr.bf16.mxu1 %v1675_v0 }
 0x576   :  { %1459 = vmatpush3.bf16.msra.mxu1 %v1983_v61  ;;  %v671_v61 = vpack.c.bf16 %v663_v59, %v664_v21 }
 0x577   :  { %1452 = vmatprep.subr.bf16.mxu1 %v1675_v0 }
 0x579   :  { %1415 = vmatmul.mubr.bf16.gmra.mrb[4].mxu1 %v670_v46 }
 0x57a   :  { %1460 = vmatpush3.bf16.msra.mxu1 %v1988_v1  ;;  %1418 = vmatprep.mubr.msk.bf16.mxu1 %vm1676_vm0, %v1675_v0  ;;  %v923_v1 = vrot.slane %v656_v33, 1 }
 0x57b   :  { %1453 = vmatprep.subr.bf16.mxu1 %v1675_v0 }
 0x57e   :  { %1461 = vmatpush3.bf16.msra.mxu1 %v1994_v4  ;;  %v924_v4 = vsel %vm401_vm3, %v922_v13, %v923_v1 }
 0x57f   :  { %1454 = vmatprep.subr.bf16.mxu1 %v1675_v0 }
 0x581   :  { %1419 = vmatmul.mubr.bf16.gmra.mrb[8].mxu1 %v671_v61 }
 0x582   :  { %1462 = vmatpush3.bf16.msra.mxu1 %v1999_v6  ;;  %1446 = vmatprep.mubr.msk.bf16.mxu1 %vm1676_vm0, %v1675_v0  ;;  %v929_v6 = vsel %vm401_vm3, %v923_v1, %v918_v50 }
 0x583   :  { %1455 = vmatprep.subr.bf16.mxu1 %v1675_v0 }
 0x586   :  { %1463 = vmatpush3.bf16.msra.mxu1 %v2003_v8  ;;  %v932_v8 = vpack.c.bf16 %v929_v6, %v924_v4 }
 0x587   :  { %1456 = vmatprep.subr.bf16.mxu1 %v1675_v0 }
 0x58a   :  { %1464 = vmatpush3.bf16.msra.mxu1 %v2008_v10 }
 0x58b   :  { %1457 = vmatprep.subr.bf16.mxu1 %v1675_v0 }
 0x58e   :  { %1465 = vmatpush3.bf16.msra.mxu1 %v2014_v12 }
 0x591   :  { %1447 = vmatmul.mubr.bf16.vlgmr.msra.gmra.mrb[8].mxu1 %v932_v8 }
 0x629   :  { %v1032_v47 = vpop.f32.mrb[12].mxu0 }
 0x62a   :  { %v1440_v48 = vpop.f32.mrb[13].mxu0 }
 0x62b   :  { %v1035_v49 = vpop.f32.mrb[14].mxu0 }
 0x62c   :  { %v1441_v10 = vpop.f32.mrb[15].mxu0 }
 0x631   :  { %v1040_v51 = vpop.f32.mrb[16].mxu0 }
 0x632   :  { %v1444_v0 = vpop.f32.mrb[17].mxu0 }
 0x633   :  { %v1043_v52 = vpop.f32.mrb[18].mxu0 }
 0x634   :  { %v1445_v54 = vpop.f32.mrb[19].mxu0 }
 0x644   :  { %v895_v56 = vpop.f32.mrb[0].mxu1 }
 0x645   :  { %v1466_v57 = vadd.f32 %v1032_v47, %v895_v56  ;;  %v1412_v58 = vpop.f32.mrb[1].mxu1 }
 0x646   :  { %v898_v60 = vpop.f32.mrb[2].mxu1 }
 0x647   :  { %v1467_v22 = vadd.f32 %v1035_v49, %v898_v60  ;;  %v1413_v62 = vpop.f32.mrb[3].mxu1  ;;  %v1061_v5 = vsel %vm1892_vm14, %v1466_v57, 0.0 }
 0x649   :  { %v1062_v3 = vsel %vm1898_vm15, %v1467_v22, 0.0 }
 0x64a   :  { %v1067_v9 = vadd.f32 %v1062_v3, %v1061_v5 }
 0x64c   :  { %v903_v11 = vpop.f32.mrb[4].mxu1 }
 0x64d   :  { %v1468_v50 = vadd.f32 %v1040_v51, %v903_v11  ;;  %v1416_v30 = vpop.f32.mrb[5].mxu1 }
 0x64e   :  { %v906_v12 = vpop.f32.mrb[6].mxu1 }
 0x64f   :  { %v1469_v63 = vadd.f32 %v1043_v52, %v906_v12  ;;  %v1417_v2 = vpop.f32.mrb[7].mxu1  ;;  %v1063_v7 = vsel %vm1910_vm7, %v1468_v50, 0.0 }
 0x650   :  { %v1068_v13 = vadd.f32 %v1067_v9, %v1063_v7 }
 0x651   :  { %v1064_v15 = vsel %vm1914_vm10, %v1469_v63, 0.0 }
 0x652   :  { %v1069_v16 = vadd.f32 %v1068_v13, %v1064_v15 }
 0x664   :  { %v1048_v17 = vpop.f32.mrb[8].mxu1 }
 0x665   :  { %v1065_v23 = vsel %vm1922_vm13, %v1048_v17, 0.0  ;;  %v1448_v24 = vpop.f32.mrb[9].mxu1 }
 0x666   :  { %v1070_v26 = vadd.f32 %v1069_v16, %v1065_v23  ;;  %v1051_v28 = vpop.f32.mrb[10].mxu1 }
 0x667   :  { %v1066_v29 = vsel %vm1926_vm1, %v1051_v28, 0.0  ;;  %v1449_v31 = vpop.f32.mrb[11].mxu1 }
 0x668   :  { %v1071_v32 = vadd.f32 %v1070_v26, %v1066_v29 }
 0x66a   :  { %v1072_v33 = vrot.slane %v1071_v32, 4 }
 0x66c   :  { %v1073_v34 = vadd.f32 %v1072_v33, %v1071_v32 }
 0x66e   :  { %v1074_v35 = vrot.slane %v1073_v34, 2 }
 0x670   :  { %v1075_v36 = vadd.f32 %v1074_v35, %v1073_v34 }
 0x672   :  { %v1076_v37 = vrot.slane %v1075_v36, 1 }
 0x674   :  { %v1077_v38 = vadd.f32 %v1076_v37, %v1075_v36 }
 0x676   :  { %1078 = vrot.lane.b32.xlu0 %v1077_v38, %s1673_s25 }
 0x6e8   :  { %v1079_v40 = vpop.permute.xlu0 %1078 }
 0x6e9   :  { %v1080_v41 = vadd.f32 %v1079_v40, %v1077_v38 }
 0x6eb   :  { %1081 = vrot.lane.b32.xlu1 %v1080_v41, %s1677_s4 }
 0x75d   :  { %v1082_v43 = vpop.permute.xlu1 %1081 }
 0x75e   :  { %v1083_v44 = vadd.f32 %v1082_v43, %v1080_v41 }
 0x760   :  { %1084 = vrot.lane.b32.xlu0 %v1083_v44, %s1678_s12 }
 0x7d2   :  { %v1085_v45 = vpop.permute.xlu0 %1084 }
 0x7d3   :  { %v1086_v18 = vadd.f32 %v1085_v45, %v1083_v44 }
 0x7d5   :  { %1087 = vrot.lane.b32.xlu1 %v1086_v18, %s1669_s11 }
 0x847   :  { %v1088_v19 = vpop.permute.xlu1 %1087 }
 0x848   :  { %v1089_v46 = vadd.f32 %v1088_v19, %v1086_v18 }
 0x84a   :  { %v1090_v20 = vmul.f32 0.001953125, %v1089_v46 }
 0x84c   :  { %v1094_v59 = vrot.slane %v1090_v20, %v1939_v14 }
 0x84e   :  { %v1095_v21 = vsub.f32 %v1466_v57, %v1094_v59  ;;  %v1096_v61 = vsub.f32 %v1467_v22, %v1094_v59  ;;  %v1097_v1 = vsub.f32 %v1468_v50, %v1094_v59  ;;  %v1098_v4 = vsub.f32 %v1469_v63, %v1094_v59 }
 0x84f   :  { %v1099_v6 = vsub.f32 %v1048_v17, %v1094_v59  ;;  %v1100_v51 = vsub.f32 %v1051_v28, %v1094_v59  ;;  %v1137_v17 = vld [vmem:[%s2204_s5] sm:$0x1]  ;;  %s1679_s5 = smov [#allocation8]  }
 0x850   :  { %v1101_v8 = vsel %vm1892_vm14, %v1095_v21, 0.0  ;;  %v1102_v47 = vsel %vm1898_vm15, %v1096_v61, 0.0  ;;  %v1103_v48 = vsel %vm1910_vm7, %v1097_v1, 0.0  ;;  %v1104_v0 = vsel %vm1914_vm10, %v1098_v4, 0.0  ;;  %v1251_v28 = vld [vmem:[%s2205_s6] ss:$0 sm:$0xff] }
 0x851   :  { %v1107_v49 = vmul.f32 %v1101_v8, %v1101_v8  ;;  %v1108_v10 = vmul.f32 %v1102_v47, %v1102_v47  ;;  %v1109_v52 = vmul.f32 %v1103_v48, %v1103_v48  ;;  %v1105_v56 = vsel %vm1922_vm13, %v1099_v6, 0.0 }
 0x852   :  { %v1110_v57 = vmul.f32 %v1104_v0, %v1104_v0  ;;  %v1106_v27 = vsel %vm1926_vm1, %v1100_v51, 0.0  ;;  %v1111_v58 = vmul.f32 %v1105_v56, %v1105_v56 }
 0x853   :  { %v1113_v54 = vadd.f32 %v1108_v10, %v1107_v49  ;;  %v1112_v39 = vmul.f32 %v1106_v27, %v1106_v27 }
 0x855   :  { %v1114_v25 = vadd.f32 %v1113_v54, %v1109_v52 }
 0x857   :  { %v1115_v60 = vadd.f32 %v1114_v25, %v1110_v57 }
 0x859   :  { %v1116_v22 = vadd.f32 %v1115_v60, %v1111_v58 }
 0x85b   :  { %v1117_v62 = vadd.f32 %v1116_v22, %v1112_v39 }
 0x85d   :  { %v1118_v11 = vrot.slane %v1117_v62, 4 }
 0x85f   :  { %v1119_v50 = vadd.f32 %v1118_v11, %v1117_v62 }
 0x861   :  { %v1120_v30 = vrot.slane %v1119_v50, 2 }
 0x863   :  { %v1121_v42 = vadd.f32 %v1120_v30, %v1119_v50 }
 0x865   :  { %v1122_v12 = vrot.slane %v1121_v42, 1 }
 0x867   :  { %v1123_v63 = vadd.f32 %v1122_v12, %v1121_v42 }
 0x869   :  { %1124 = vrot.lane.b32.xlu0 %v1123_v63, %s1673_s25 }
 0x8db   :  { %v1125_v53 = vpop.permute.xlu0 %1124 }
 0x8dc   :  { %v1126_v2 = vadd.f32 %v1125_v53, %v1123_v63 }
 0x8de   :  { %1127 = vrot.lane.b32.xlu1 %v1126_v2, %s1677_s4 }
 0x950   :  { %v1128_v3 = vpop.permute.xlu1 %1127 }
 0x951   :  { %v1129_v55 = vadd.f32 %v1128_v3, %v1126_v2 }
 0x953   :  { %1130 = vrot.lane.b32.xlu0 %v1129_v55, %s1678_s12 }
 0x9c5   :  { %v1131_v5 = vpop.permute.xlu0 %1130 }
 0x9c6   :  { %v1132_v7 = vadd.f32 %v1131_v5, %v1129_v55 }
 0x9c8   :  { %1133 = vrot.lane.b32.xlu1 %v1132_v7, %s1669_s11  ;;  %s1183_s11 = sshll.u32 %s1679_s5, 4  ;;  %s1184_s11 = int_to_ptr.vmem [resolvable:$true] %s1183_s11 }
 0x9c9   :  { %s1640_s6 = scalar_lea.vmem %s1184_s11, 512  ;;  %p1645_p11 = scmp.lt.s32.totalorder %s1184_s11, %s1184_s11 }
 0x9ca   :  { %p1641_p10 = scmp.ne.s32.totalorder %s1184_s11, %s1640_s6  ;;  %p1646_p12 = scmp.lt.s32.totalorder %s1640_s6, %s1640_s6 }
 0x9cc   :  { %p1647_p13 = por %p1646_p12, %p1645_p11 }
 0x9ce   :  { %p1648_p0 = pnand %p1647_p13, %p1641_p10 }
 0xa3a   :  { %v1134_v9 = vpop.permute.xlu1 %1133 }
 0xa3b   :  { %v1135_v13 = vadd.f32 %v1134_v9, %v1132_v7 }
 0xa3d   :  { %v1136_v15 = vmul.f32 0.001953125, %v1135_v13 }
 0xa3f   :  { %v1138_v16 = vadd.f32 1e-05, %v1136_v15 }
 0xa41   :  { %1572 = vrsqrt.f32 %v1138_v16 }
 0xa4b   :  { %v1573_v23 = vpop.eup %1572 }
 0xa4c   :  { %v1140_v24 = vmul.f32 %v1573_v23, %v1137_v17 }
 0xa4e   :  { %v1145_v26 = vrot.slane %v1140_v24, %v1939_v14 }
 0xa50   :  { %v1147_v29 = vmul.f32 %v1145_v26, %v1095_v21  ;;  %v1148_v31 = vmul.f32 %v1145_v26, %v1096_v61  ;;  %v1149_v32 = vmul.f32 %v1145_v26, %v1098_v4  ;;  %v1150_v33 = vmul.f32 %v1145_v26, %v1099_v6 }
 0xa52   :  { %v1158_v34 = vadd.f32 %v1251_v28, %v1147_v29  ;;  %v1159_v35 = vadd.f32 %v1251_v28, %v1148_v31  ;;  %v1160_v36 = vadd.f32 %v1251_v28, %v1149_v32  ;;  %v1161_v37 = vadd.f32 %v1251_v28, %v1150_v33 }
 0xa54   :  { %vm1162_vm0 = vcmp.gt.f32.partialorder %v1158_v34, 0.0  ;;  %vm1163_vm2 = vcmp.gt.f32.partialorder %v1159_v35, 0.0  ;;  %vm1164_vm3 = vcmp.gt.f32.partialorder %v1160_v36, 0.0  ;;  %vm1165_vm14 = vcmp.gt.f32.partialorder %v1161_v37, 0.0 }
 0xa55   :  { %v1166_v38 = vmul.f32 0.2, %v1158_v34  ;;  %v1167_v14 = vmul.f32 0.2, %v1159_v35  ;;  %v1168_v40 = vmul.f32 0.2, %v1160_v36 }
 0xa56   :  { %v1169_v41 = vmul.f32 0.2, %v1161_v37 }
 0xa57   :  { %v1170_v43 = vsel %vm1162_vm0, %v1158_v34, %v1166_v38  ;;  %v1171_v44 = vsel %vm1163_vm2, %v1159_v35, %v1167_v14  ;;  %v1172_v45 = vsel %vm1164_vm3, %v1160_v36, %v1168_v40 }
 0xa58   :  { %v1173_v18 = vsel %vm1165_vm14, %v1161_v37, %v1169_v41  ;;  %1174 = vst [vmem:[#allocation8] sm:$0xff] %v1170_v43  ;;  %1175 = vst [vmem:[#allocation8 + $0x8] sm:$0xff] %v1171_v44 }
 0xa59   :  { %1176 = vst [vmem:[#allocation8 + $0x10] sm:$0xff] %v1172_v45  ;;  %1177 = vst [vmem:[#allocation8 + $0x18] sm:$0xff] %v1173_v18 }
 0xa5a   :  { %1651 = shalt.err (!%p1648_p0)
}
 0xa5b   :  { %s1652_s27 = scalar_lea.hbm %s2206_s7, 512 }
 0xa5c   :  { %p1653_p1 = scmp.ne.s32.totalorder %s2206_s7, %s1652_s27  ;;  %p1656_p2 = scmp.lt.u32.totalorder %s1652_s27, %s2206_s7 }
 0xa5e   :  { %p1658_p3 = pnand %p1656_p2, %p1653_p1 }
 0xa60   :  { %1661 = shalt.err (!%p1658_p3)
}
 0xa61   :  { %1189 = dma.vmem_to_hbm [thread:$0]  %s1184_s11, 512, %s2206_s7, [#allocation4], %s1672_s1, %s1672_s1, %s1673_s25  }
 0xa62   :  { %1666 = dma.done.wait [#allocation4], 512  }
 0xa63   :  { %1667 = vsyncadd [#allocation4], 4294966784 }
 0xa64   :  { %1193 = vsyncpa [#allocation3], 1 }
 0xa65   :  { %1194 = vsyncpa [#allocation6], 1 }
 0xa66   :  { %1195 = vsyncpa [#allocation4], 1 }

</bundles_post_ra>
